<compile_context>
chip_gen: v7x
topology: tpu7x:2x2x1
jax: 0.10.0
libtpu: 0.0.40
codegen_flags: <defaults>
</compile_context>

<pallas_src>
import math

import jax
import jax.numpy as jnp
from jax.experimental import pallas as pl
from jax.experimental.pallas import tpu as pltpu

# ----------------------------- config (small, synthetic) ---------------------
B = 2            # batch
S = 8            # sequence length
BS = B * S       # flattened tokens
H = 32           # hidden size
F = 64           # FFN inner size
D = 16           # sentence-embedding dim (only column 0 is the prediction)
V = 50           # vocab size
V_PAD = 56       # vocab rows padded to a sublane multiple (8)

# ---- packed parameter slab row offsets (matrix blocks are 8-row aligned) -----
W_COLS = 64
R_EMB = 0                    # [V_PAD, H]  token embedding table (rows >=V are 0)
R_WQ = R_EMB + V_PAD         # [H, H]
R_WK = R_WQ + H              # [H, H]
R_WV = R_WK + H              # [H, H]
R_WO = R_WV + H              # [H, H]
R_WFF1 = R_WO + H            # [H, F]
R_WFF2 = R_WFF1 + H          # [F, H]
R_WD = R_WFF2 + F            # [H, 1]  column 0 of the Dense head
R_VEC = R_WD + H             # vector params start here (one row each)
RV_BQ = R_VEC + 0
RV_BK = R_VEC + 1
RV_BV = R_VEC + 2
RV_BO = R_VEC + 3
RV_LN1G = R_VEC + 4
RV_LN1B = R_VEC + 5
RV_LN2G = R_VEC + 6
RV_LN2B = R_VEC + 7
RV_BFF1 = R_VEC + 8
RV_BFF2 = R_VEC + 9
RV_BD = R_VEC + 10
W_ROWS = 328                 # 323 used, padded to a sublane multiple

# ---- packed aux slab row offsets (cols = BS) ---------------------------------
A_COLS = BS
R_BIAS = 0                   # [BS, BS] additive attention bias (0 / -1e9)
R_POOL = R_BIAS + BS         # [B, BS]  masked-mean pooling matrix
R_LBL = R_POOL + B           # [B, 1]   labels in column 0
A_ROWS = 24                  # 20 used, padded to a sublane multiple


# ----------------------------- math helpers ----------------------------------
def _layer_norm(x, gamma, beta, eps=1e-12):
    mu = jnp.mean(x, axis=-1, keepdims=True)
    var = jnp.mean((x - mu) ** 2, axis=-1, keepdims=True)
    return (x - mu) * jax.lax.rsqrt(var + eps) * gamma + beta


def _gelu(x):
    c = math.sqrt(2.0 / math.pi)
    return 0.5 * x * (1.0 + jnp.tanh(c * (x + 0.044715 * x * x * x)))


def _sigmoid(x):
    return 1.0 / (1.0 + jnp.exp(-x))


# ----------------------------- the Pallas kernel ------------------------------
def sbert_bce_kernel(ids_ref, aux_ref, w_ref, loss_ref):
    # ---- fused embedding lookup: one-hot(ids) @ emb_table (single MXU op) ----
    iota_v = jax.lax.broadcasted_iota(jnp.int32, (BS, V_PAD), 1)
    onehot = jnp.where(ids_ref[...] == iota_v, 1.0, 0.0)          # [BS, V_PAD]
    x = jnp.dot(onehot, w_ref[R_EMB:R_EMB + V_PAD, 0:H],
                preferred_element_type=jnp.float32)               # [BS, H]

    # ---- single-head self-attention on flattened tokens ----------------------
    q = jnp.dot(x, w_ref[R_WQ:R_WQ + H, 0:H],
                preferred_element_type=jnp.float32) + w_ref[RV_BQ:RV_BQ + 1, 0:H]
    k = jnp.dot(x, w_ref[R_WK:R_WK + H, 0:H],
                preferred_element_type=jnp.float32) + w_ref[RV_BK:RV_BK + 1, 0:H]
    v = jnp.dot(x, w_ref[R_WV:R_WV + H, 0:H],
                preferred_element_type=jnp.float32) + w_ref[RV_BV:RV_BV + 1, 0:H]

    # scores over all flattened tokens; cross-batch / padded-key pairs carry a
    # precomputed -1e9 additive bias, so this is exactly per-batch attention.
    scores = jax.lax.dot_general(q, k, (((1,), (1,)), ((), ())),
                                 preferred_element_type=jnp.float32)  # [BS, BS]
    scores = (scores * jnp.float32(1.0 / math.sqrt(H))
              + aux_ref[R_BIAS:R_BIAS + BS, 0:BS])

    m = jnp.max(scores, axis=-1, keepdims=True)
    p = jnp.exp(scores - m)
    denom = jnp.sum(p, axis=-1, keepdims=True)
    attn = p * pl.reciprocal(denom, approx=True)                   # EUP slot

    ctx = jnp.dot(attn, v, preferred_element_type=jnp.float32)     # [BS, H]
    attn_out = jnp.dot(ctx, w_ref[R_WO:R_WO + H, 0:H],
                       preferred_element_type=jnp.float32) \
        + w_ref[RV_BO:RV_BO + 1, 0:H]
    h1 = _layer_norm(x + attn_out,
                     w_ref[RV_LN1G:RV_LN1G + 1, 0:H],
                     w_ref[RV_LN1B:RV_LN1B + 1, 0:H])

    # ---- feed-forward ---------------------------------------------------------
    ff = _gelu(jnp.dot(h1, w_ref[R_WFF1:R_WFF1 + H, 0:F],
                       preferred_element_type=jnp.float32)
               + w_ref[RV_BFF1:RV_BFF1 + 1, 0:F])
    ff = jnp.dot(ff, w_ref[R_WFF2:R_WFF2 + F, 0:H],
                 preferred_element_type=jnp.float32) \
        + w_ref[RV_BFF2:RV_BFF2 + 1, 0:H]
    h2 = _layer_norm(h1 + ff,
                     w_ref[RV_LN2G:RV_LN2G + 1, 0:H],
                     w_ref[RV_LN2B:RV_LN2B + 1, 0:H])

    # ---- masked mean pooling as a matmul: [B, BS] @ [BS, H] -------------------
    pooled = jnp.dot(aux_ref[R_POOL:R_POOL + B, 0:BS], h2,
                     preferred_element_type=jnp.float32)           # [B, H]

    # ---- head: only column 0 of the Dense layer; BCE-with-logits --------------
    z = jnp.dot(pooled, w_ref[R_WD:R_WD + H, 0:1],
                preferred_element_type=jnp.float32) \
        + w_ref[RV_BD:RV_BD + 1, 0:1]                              # [B, 1] logit
    y = aux_ref[R_LBL:R_LBL + B, 0:1]                              # [B, 1]
    # BCE(sigmoid(z), y) == softplus(z) - y*z  (stable form, no log(0))
    softplus = jnp.maximum(z, 0.0) + jnp.log1p(jnp.exp(-jnp.abs(z)))
    bce = softplus - y * z
    loss_ref[...] = jnp.mean(bce, axis=0, keepdims=True)           # [1, 1]


# ----------------------------- wrapper ----------------------------------------
def _blk(a):
    """One slab block: 2-D (or row-vector) padded to W_COLS columns, f32."""
    a = jnp.asarray(a, jnp.float32)
    if a.ndim == 1:
        a = a.reshape(1, -1)
    return jnp.pad(a, ((0, 0), (0, W_COLS - a.shape[1])))


def sent_transformer_bce_loss(input_ids, attention_mask, labels, params):
    # ---- glue: pack params / precompute masks (folded by XLA; pack once when
    # ---- closing over parameters in a real training step) ---------------------
    w_slab = jnp.concatenate([
        jnp.pad(params["emb_table"].astype(jnp.float32),
                ((0, V_PAD - V), (0, W_COLS - H))),
        _blk(params["wq"]), _blk(params["wk"]),
        _blk(params["wv"]), _blk(params["wo"]),
        _blk(params["wff1"]), _blk(params["wff2"]),
        _blk(params["wd"][:, 0:1]),
        _blk(params["bq"]), _blk(params["bk"]),
        _blk(params["bv"]), _blk(params["bo"]),
        _blk(params["ln1_g"]), _blk(params["ln1_b"]),
        _blk(params["ln2_g"]), _blk(params["ln2_b"]),
        _blk(params["bff1"]), _blk(params["bff2"]),
        _blk(params["bd"][0:1]),
    ], axis=0)                                                     # [323, 64]
    w_slab = jnp.pad(w_slab, ((0, W_ROWS - w_slab.shape[0]), (0, 0)))

    mask = attention_mask.astype(jnp.float32)                      # [B, S]
    batch_id = jnp.repeat(jnp.arange(B), S)                        # [BS]

    # additive attention bias: 0 where (same batch AND key valid), else -1e9
    key_valid = mask.reshape(BS) > 0.5
    same_tok = batch_id[:, None] == batch_id[None, :]
    attn_bias = jnp.where(same_tok & key_valid[None, :],
                          0.0, -1e9).astype(jnp.float32)           # [BS, BS]

    # pooling matrix: pool[b, b*S+s] = mask[b,s] / max(sum(mask[b]), 1)
    msum = jnp.maximum(jnp.sum(mask, axis=1, keepdims=True), 1.0)  # [B, 1]
    same_b = (jnp.arange(B)[:, None] == batch_id[None, :]).astype(jnp.float32)
    pool_mat = same_b * (mask / msum).reshape(1, BS)               # [B, BS]

    lbl_col = jnp.pad(labels.astype(jnp.float32).reshape(B, 1),
                      ((0, 0), (0, A_COLS - 1)))                   # [B, BS]
    aux_slab = jnp.concatenate([attn_bias, pool_mat, lbl_col], axis=0)
    aux_slab = jnp.pad(aux_slab, ((0, A_ROWS - aux_slab.shape[0]), (0, 0)))

    ids2d = input_ids.astype(jnp.int32).reshape(BS, 1)             # [BS, 1]

    vmem = pl.BlockSpec(memory_space=pltpu.MemorySpace.VMEM)
    out = pl.pallas_call(
        sbert_bce_kernel,
        out_shape=jax.ShapeDtypeStruct((1, 1), jnp.float32),
        in_specs=[vmem, vmem, vmem],
        out_specs=vmem,
    )(ids2d, aux_slab, w_slab)
    return out[0, 0]


# ----------------------------- pure-JAX reference ------------------------------
def reference_loss(input_ids, attention_mask, labels, params):
    x = params["emb_table"][input_ids].astype(jnp.float32)         # [B, S, H]
    mask = attention_mask.astype(jnp.float32)
    q = jnp.einsum("bsh,hk->bsk", x, params["wq"]) + params["bq"]
    k = jnp.einsum("bsh,hk->bsk", x, params["wk"]) + params["bk"]
    v = jnp.einsum("bsh,hk->bsk", x, params["wv"]) + params["bv"]
    scores = jnp.einsum("bqh,bkh->bqk", q, k) / math.sqrt(H)
    scores = scores + (mask[:, None, :] - 1.0) * 1e9
    attn = jax.nn.softmax(scores, axis=-1)
    ctx = jnp.einsum("bqk,bkh->bqh", attn, v)
    attn_out = jnp.einsum("bqh,ho->bqo", ctx, params["wo"]) + params["bo"]
    h1 = _layer_norm(x + attn_out, params["ln1_g"], params["ln1_b"])
    ff = _gelu(jnp.einsum("bsh,hf->bsf", h1, params["wff1"]) + params["bff1"])
    ff = jnp.einsum("bsf,fh->bsh", ff, params["wff2"]) + params["bff2"]
    h2 = _layer_norm(h1 + ff, params["ln2_g"], params["ln2_b"])
    pooled = jnp.sum(h2 * mask[:, :, None], axis=1) / jnp.sum(mask, -1,
                                                              keepdims=True)
    emb = _sigmoid(jnp.dot(pooled, params["wd"]) + params["bd"])
    pred = emb[:, 0]
    y = labels.astype(jnp.float32)
    return jnp.mean(-(y * jnp.log(pred) + (1.0 - y) * jnp.log(1.0 - pred)))


# ----------------------------- main --------------------------------------------
if __name__ == "__main__":
    key = jax.random.PRNGKey(0)
    ks = jax.random.split(key, 20)

    def init(k, shape, scale=0.02):
        return (scale * jax.random.normal(k, shape)).astype(jnp.float32)

    params = {
        "emb_table": init(ks[0], (V, H)),
        "wq": init(ks[1], (H, H)), "bq": init(ks[2], (H,)),
        "wk": init(ks[3], (H, H)), "bk": init(ks[4], (H,)),
        "wv": init(ks[5], (H, H)), "bv": init(ks[6], (H,)),
        "wo": init(ks[7], (H, H)), "bo": init(ks[8], (H,)),
        "ln1_g": jnp.ones((H,), jnp.float32),
        "ln1_b": jnp.zeros((H,), jnp.float32),
        "ln2_g": jnp.ones((H,), jnp.float32),
        "ln2_b": jnp.zeros((H,), jnp.float32),
        "wff1": init(ks[9], (H, F)), "bff1": init(ks[10], (F,)),
        "wff2": init(ks[11], (F, H)), "bff2": init(ks[12], (H,)),
        "wd": init(ks[13], (H, D)), "bd": init(ks[14], (D,)),
    }

    input_ids = jax.random.randint(ks[15], (B, S), 0, V)
    # example padding: second sequence has 3 padded positions
    attention_mask = (jnp.arange(S)[None, :]
                      < jnp.array([[S], [S - 3]])).astype(jnp.float32)
    labels = jax.random.bernoulli(ks[16], 0.5, (B,)).astype(jnp.float32)

    loss = sent_transformer_bce_loss(input_ids, attention_mask, labels, params)
    loss = jax.block_until_ready(loss)

    ref = reference_loss(input_ids, attention_mask, labels, params)
    assert jnp.isfinite(loss), "loss is not finite"
    assert jnp.allclose(loss, ref, atol=2e-3, rtol=2e-3), (loss, ref)

    print("KERNEL_OK")
</pallas_src>

<mosaic_0001>
module attributes {stable_mosaic.version = 11 : i64} {
  func.func @sbert_bce_kernel(%arg0: memref<16x1xi32, #tpu.memory_space<vmem>>, %arg1: memref<24x16xf32, #tpu.memory_space<vmem>>, %arg2: memref<328x64xf32, #tpu.memory_space<vmem>>, %arg3: memref<1x1xf32, #tpu.memory_space<vmem>>) attributes {dimension_semantics = [], scalar_prefetch = 0 : i64, scratch_operands = 0 : i64, tpu.core_type = #tpu.core_type<tc>} {
    %0 = tpu.iota {dimensions = array<i32: 1>} : vector<16x56xi32>
    %c0 = arith.constant 0 : index
    %c0_0 = arith.constant 0 : index
    %1 = vector.load %arg0[%c0, %c0_0] : memref<16x1xi32, #tpu.memory_space<vmem>>, vector<16x1xi32>
    %2 = vector.broadcast %1 : vector<16x1xi32> to vector<16x56xi32>
    %3 = arith.cmpi eq, %2, %0 : vector<16x56xi32>
    %cst = arith.constant 1.000000e+00 : f32
    %cst_1 = arith.constant 0.000000e+00 : f32
    %4 = vector.broadcast %cst : f32 to vector<16x56xf32>
    %5 = vector.broadcast %cst_1 : f32 to vector<16x56xf32>
    %6 = arith.select %3, %4, %5 : vector<16x56xi1>, vector<16x56xf32>
    %c0_2 = arith.constant 0 : index
    %c0_3 = arith.constant 0 : index
    %7 = vector.load %arg2[%c0_2, %c0_3] : memref<328x64xf32, #tpu.memory_space<vmem>>, vector<56x32xf32>
    %cst_4 = arith.constant dense<0.000000e+00> : vector<16x32xf32>
    %8 = tpu.matmul %6, %7, %cst_4 {dimension_numbers = #tpu.dot_dimension_numbers<[1], [0], [0], [1], [0, 0, 1, 1], [], []>} : vector<16x56xf32>, vector<56x32xf32>, vector<16x32xf32> -> vector<16x32xf32>
    %c56 = arith.constant 56 : index
    %c0_5 = arith.constant 0 : index
    %9 = vector.load %arg2[%c56, %c0_5] : memref<328x64xf32, #tpu.memory_space<vmem>>, vector<32x32xf32>
    %cst_6 = arith.constant dense<0.000000e+00> : vector<16x32xf32>
    %10 = tpu.matmul %8, %9, %cst_6 {dimension_numbers = #tpu.dot_dimension_numbers<[1], [0], [0], [1], [0, 0, 1, 1], [], []>} : vector<16x32xf32>, vector<32x32xf32>, vector<16x32xf32> -> vector<16x32xf32>
    %c312 = arith.constant 312 : index
    %c0_7 = arith.constant 0 : index
    %11 = vector.load %arg2[%c312, %c0_7] : memref<328x64xf32, #tpu.memory_space<vmem>>, vector<1x32xf32>
    %12 = vector.broadcast %11 : vector<1x32xf32> to vector<16x32xf32>
    %13 = arith.addf %10, %12 : vector<16x32xf32>
    %c88 = arith.constant 88 : index
    %c0_8 = arith.constant 0 : index
    %14 = vector.load %arg2[%c88, %c0_8] : memref<328x64xf32, #tpu.memory_space<vmem>>, vector<32x32xf32>
    %cst_9 = arith.constant dense<0.000000e+00> : vector<16x32xf32>
    %15 = tpu.matmul %8, %14, %cst_9 {dimension_numbers = #tpu.dot_dimension_numbers<[1], [0], [0], [1], [0, 0, 1, 1], [], []>} : vector<16x32xf32>, vector<32x32xf32>, vector<16x32xf32> -> vector<16x32xf32>
    %c313 = arith.constant 313 : index
    %c0_10 = arith.constant 0 : index
    %16 = vector.load %arg2[%c313, %c0_10] : memref<328x64xf32, #tpu.memory_space<vmem>>, vector<1x32xf32>
    %17 = vector.broadcast %16 : vector<1x32xf32> to vector<16x32xf32>
    %18 = arith.addf %15, %17 : vector<16x32xf32>
    %c120 = arith.constant 120 : index
    %c0_11 = arith.constant 0 : index
    %19 = vector.load %arg2[%c120, %c0_11] : memref<328x64xf32, #tpu.memory_space<vmem>>, vector<32x32xf32>
    %cst_12 = arith.constant dense<0.000000e+00> : vector<16x32xf32>
    %20 = tpu.matmul %8, %19, %cst_12 {dimension_numbers = #tpu.dot_dimension_numbers<[1], [0], [0], [1], [0, 0, 1, 1], [], []>} : vector<16x32xf32>, vector<32x32xf32>, vector<16x32xf32> -> vector<16x32xf32>
    %c314 = arith.constant 314 : index
    %c0_13 = arith.constant 0 : index
    %21 = vector.load %arg2[%c314, %c0_13] : memref<328x64xf32, #tpu.memory_space<vmem>>, vector<1x32xf32>
    %22 = vector.broadcast %21 : vector<1x32xf32> to vector<16x32xf32>
    %23 = arith.addf %20, %22 : vector<16x32xf32>
    %cst_14 = arith.constant dense<0.000000e+00> : vector<16x16xf32>
    %24 = tpu.matmul %13, %18, %cst_14 {dimension_numbers = #tpu.dot_dimension_numbers<[1], [1], [0], [0], [0, 0, 1, 0], [], []>} : vector<16x32xf32>, vector<16x32xf32>, vector<16x16xf32> -> vector<16x16xf32>
    %cst_15 = arith.constant 0.176776692 : f32
    %25 = vector.broadcast %cst_15 : f32 to vector<16x16xf32>
    %26 = arith.mulf %24, %25 : vector<16x16xf32>
    %c0_16 = arith.constant 0 : index
    %c0_17 = arith.constant 0 : index
    %27 = vector.load %arg1[%c0_16, %c0_17] : memref<24x16xf32, #tpu.memory_space<vmem>>, vector<16x16xf32>
    %28 = arith.addf %26, %27 : vector<16x16xf32>
    %cst_18 = arith.constant dense<0xFF800000> : vector<16xf32>
    %29 = vector.multi_reduction <maximumf>, %28, %cst_18 [1] : vector<16x16xf32> to vector<16xf32>
    %30 = vector.shape_cast %29 : vector<16xf32> to vector<16x1xf32>
    %31 = vector.broadcast %30 : vector<16x1xf32> to vector<16x16xf32>
    %32 = arith.subf %28, %31 : vector<16x16xf32>
    %33 = math.exp %32 : vector<16x16xf32>
    %cst_19 = arith.constant dense<0.000000e+00> : vector<16xf32>
    %34 = vector.multi_reduction <add>, %33, %cst_19 [1] : vector<16x16xf32> to vector<16xf32>
    %35 = vector.shape_cast %34 : vector<16xf32> to vector<16x1xf32>
    %36 = tpu.reciprocal %35 {approx = true} : vector<16x1xf32> -> vector<16x1xf32>
    %37 = vector.broadcast %36 : vector<16x1xf32> to vector<16x16xf32>
    %38 = arith.mulf %33, %37 : vector<16x16xf32>
    %cst_20 = arith.constant dense<0.000000e+00> : vector<16x32xf32>
    %39 = tpu.matmul %38, %23, %cst_20 {dimension_numbers = #tpu.dot_dimension_numbers<[1], [0], [0], [1], [0, 0, 1, 1], [], []>} : vector<16x16xf32>, vector<16x32xf32>, vector<16x32xf32> -> vector<16x32xf32>
    %c152 = arith.constant 152 : index
    %c0_21 = arith.constant 0 : index
    %40 = vector.load %arg2[%c152, %c0_21] : memref<328x64xf32, #tpu.memory_space<vmem>>, vector<32x32xf32>
    %cst_22 = arith.constant dense<0.000000e+00> : vector<16x32xf32>
    %41 = tpu.matmul %39, %40, %cst_22 {dimension_numbers = #tpu.dot_dimension_numbers<[1], [0], [0], [1], [0, 0, 1, 1], [], []>} : vector<16x32xf32>, vector<32x32xf32>, vector<16x32xf32> -> vector<16x32xf32>
    %c315 = arith.constant 315 : index
    %c0_23 = arith.constant 0 : index
    %42 = vector.load %arg2[%c315, %c0_23] : memref<328x64xf32, #tpu.memory_space<vmem>>, vector<1x32xf32>
    %43 = vector.broadcast %42 : vector<1x32xf32> to vector<16x32xf32>
    %44 = arith.addf %41, %43 : vector<16x32xf32>
    %45 = arith.addf %8, %44 : vector<16x32xf32>
    %c316 = arith.constant 316 : index
    %c0_24 = arith.constant 0 : index
    %46 = vector.load %arg2[%c316, %c0_24] : memref<328x64xf32, #tpu.memory_space<vmem>>, vector<1x32xf32>
    %c317 = arith.constant 317 : index
    %c0_25 = arith.constant 0 : index
    %47 = vector.load %arg2[%c317, %c0_25] : memref<328x64xf32, #tpu.memory_space<vmem>>, vector<1x32xf32>
    %cst_26 = arith.constant dense<0.000000e+00> : vector<16xf32>
    %48 = vector.multi_reduction <add>, %45, %cst_26 [1] : vector<16x32xf32> to vector<16xf32>
    %49 = vector.shape_cast %48 : vector<16xf32> to vector<16x1xf32>
    %cst_27 = arith.constant 3.200000e+01 : f32
    %50 = vector.broadcast %cst_27 : f32 to vector<16x1xf32>
    %51 = arith.divf %49, %50 : vector<16x1xf32>
    %52 = vector.broadcast %51 : vector<16x1xf32> to vector<16x32xf32>
    %53 = arith.subf %45, %52 : vector<16x32xf32>
    %54 = arith.mulf %53, %53 : vector<16x32xf32>
    %cst_28 = arith.constant dense<0.000000e+00> : vector<16xf32>
    %55 = vector.multi_reduction <add>, %54, %cst_28 [1] : vector<16x32xf32> to vector<16xf32>
    %56 = vector.shape_cast %55 : vector<16xf32> to vector<16x1xf32>
    %cst_29 = arith.constant 3.200000e+01 : f32
    %57 = vector.broadcast %cst_29 : f32 to vector<16x1xf32>
    %58 = arith.divf %56, %57 : vector<16x1xf32>
    %59 = vector.broadcast %51 : vector<16x1xf32> to vector<16x32xf32>
    %60 = arith.subf %45, %59 : vector<16x32xf32>
    %cst_30 = arith.constant 9.99999996E-13 : f32
    %61 = vector.broadcast %cst_30 : f32 to vector<16x1xf32>
    %62 = arith.addf %58, %61 : vector<16x1xf32>
    %63 = math.rsqrt %62 : vector<16x1xf32>
    %64 = vector.broadcast %63 : vector<16x1xf32> to vector<16x32xf32>
    %65 = arith.mulf %60, %64 : vector<16x32xf32>
    %66 = vector.broadcast %46 : vector<1x32xf32> to vector<16x32xf32>
    %67 = arith.mulf %65, %66 : vector<16x32xf32>
    %68 = vector.broadcast %47 : vector<1x32xf32> to vector<16x32xf32>
    %69 = arith.addf %67, %68 : vector<16x32xf32>
    %c184 = arith.constant 184 : index
    %c0_31 = arith.constant 0 : index
    %70 = vector.load %arg2[%c184, %c0_31] : memref<328x64xf32, #tpu.memory_space<vmem>>, vector<32x64xf32>
    %cst_32 = arith.constant dense<0.000000e+00> : vector<16x64xf32>
    %71 = tpu.matmul %69, %70, %cst_32 {dimension_numbers = #tpu.dot_dimension_numbers<[1], [0], [0], [1], [0, 0, 1, 1], [], []>} : vector<16x32xf32>, vector<32x64xf32>, vector<16x64xf32> -> vector<16x64xf32>
    %c320 = arith.constant 320 : index
    %c0_33 = arith.constant 0 : index
    %72 = vector.load %arg2[%c320, %c0_33] : memref<328x64xf32, #tpu.memory_space<vmem>>, vector<1x64xf32>
    %73 = vector.broadcast %72 : vector<1x64xf32> to vector<16x64xf32>
    %74 = arith.addf %71, %73 : vector<16x64xf32>
    %cst_34 = arith.constant 5.000000e-01 : f32
    %75 = vector.broadcast %cst_34 : f32 to vector<16x64xf32>
    %76 = arith.mulf %75, %74 : vector<16x64xf32>
    %cst_35 = arith.constant 4.471500e-02 : f32
    %77 = vector.broadcast %cst_35 : f32 to vector<16x64xf32>
    %78 = arith.mulf %77, %74 : vector<16x64xf32>
    %79 = arith.mulf %78, %74 : vector<16x64xf32>
    %80 = arith.mulf %79, %74 : vector<16x64xf32>
    %81 = arith.addf %74, %80 : vector<16x64xf32>
    %cst_36 = arith.constant 0.797884583 : f32
    %82 = vector.broadcast %cst_36 : f32 to vector<16x64xf32>
    %83 = arith.mulf %82, %81 : vector<16x64xf32>
    %84 = math.tanh %83 : vector<16x64xf32>
    %cst_37 = arith.constant 1.000000e+00 : f32
    %85 = vector.broadcast %cst_37 : f32 to vector<16x64xf32>
    %86 = arith.addf %85, %84 : vector<16x64xf32>
    %87 = arith.mulf %76, %86 : vector<16x64xf32>
    %c216 = arith.constant 216 : index
    %c0_38 = arith.constant 0 : index
    %88 = vector.load %arg2[%c216, %c0_38] : memref<328x64xf32, #tpu.memory_space<vmem>>, vector<64x32xf32>
    %cst_39 = arith.constant dense<0.000000e+00> : vector<16x32xf32>
    %89 = tpu.matmul %87, %88, %cst_39 {dimension_numbers = #tpu.dot_dimension_numbers<[1], [0], [0], [1], [0, 0, 1, 1], [], []>} : vector<16x64xf32>, vector<64x32xf32>, vector<16x32xf32> -> vector<16x32xf32>
    %c321 = arith.constant 321 : index
    %c0_40 = arith.constant 0 : index
    %90 = vector.load %arg2[%c321, %c0_40] : memref<328x64xf32, #tpu.memory_space<vmem>>, vector<1x32xf32>
    %91 = vector.broadcast %90 : vector<1x32xf32> to vector<16x32xf32>
    %92 = arith.addf %89, %91 : vector<16x32xf32>
    %93 = arith.addf %69, %92 : vector<16x32xf32>
    %c318 = arith.constant 318 : index
    %c0_41 = arith.constant 0 : index
    %94 = vector.load %arg2[%c318, %c0_41] : memref<328x64xf32, #tpu.memory_space<vmem>>, vector<1x32xf32>
    %c319 = arith.constant 319 : index
    %c0_42 = arith.constant 0 : index
    %95 = vector.load %arg2[%c319, %c0_42] : memref<328x64xf32, #tpu.memory_space<vmem>>, vector<1x32xf32>
    %cst_43 = arith.constant dense<0.000000e+00> : vector<16xf32>
    %96 = vector.multi_reduction <add>, %93, %cst_43 [1] : vector<16x32xf32> to vector<16xf32>
    %97 = vector.shape_cast %96 : vector<16xf32> to vector<16x1xf32>
    %cst_44 = arith.constant 3.200000e+01 : f32
    %98 = vector.broadcast %cst_44 : f32 to vector<16x1xf32>
    %99 = arith.divf %97, %98 : vector<16x1xf32>
    %100 = vector.broadcast %99 : vector<16x1xf32> to vector<16x32xf32>
    %101 = arith.subf %93, %100 : vector<16x32xf32>
    %102 = arith.mulf %101, %101 : vector<16x32xf32>
    %cst_45 = arith.constant dense<0.000000e+00> : vector<16xf32>
    %103 = vector.multi_reduction <add>, %102, %cst_45 [1] : vector<16x32xf32> to vector<16xf32>
    %104 = vector.shape_cast %103 : vector<16xf32> to vector<16x1xf32>
    %cst_46 = arith.constant 3.200000e+01 : f32
    %105 = vector.broadcast %cst_46 : f32 to vector<16x1xf32>
    %106 = arith.divf %104, %105 : vector<16x1xf32>
    %107 = vector.broadcast %99 : vector<16x1xf32> to vector<16x32xf32>
    %108 = arith.subf %93, %107 : vector<16x32xf32>
    %cst_47 = arith.constant 9.99999996E-13 : f32
    %109 = vector.broadcast %cst_47 : f32 to vector<16x1xf32>
    %110 = arith.addf %106, %109 : vector<16x1xf32>
    %111 = math.rsqrt %110 : vector<16x1xf32>
    %112 = vector.broadcast %111 : vector<16x1xf32> to vector<16x32xf32>
    %113 = arith.mulf %108, %112 : vector<16x32xf32>
    %114 = vector.broadcast %94 : vector<1x32xf32> to vector<16x32xf32>
    %115 = arith.mulf %113, %114 : vector<16x32xf32>
    %116 = vector.broadcast %95 : vector<1x32xf32> to vector<16x32xf32>
    %117 = arith.addf %115, %116 : vector<16x32xf32>
    %c16 = arith.constant 16 : index
    %c0_48 = arith.constant 0 : index
    %118 = vector.load %arg1[%c16, %c0_48] : memref<24x16xf32, #tpu.memory_space<vmem>>, vector<2x16xf32>
    %cst_49 = arith.constant dense<0.000000e+00> : vector<2x32xf32>
    %119 = tpu.matmul %118, %117, %cst_49 {dimension_numbers = #tpu.dot_dimension_numbers<[1], [0], [0], [1], [0, 0, 1, 1], [], []>} : vector<2x16xf32>, vector<16x32xf32>, vector<2x32xf32> -> vector<2x32xf32>
    %c280 = arith.constant 280 : index
    %c0_50 = arith.constant 0 : index
    %120 = vector.load %arg2[%c280, %c0_50] : memref<328x64xf32, #tpu.memory_space<vmem>>, vector<32x1xf32>
    %cst_51 = arith.constant dense<0.000000e+00> : vector<2x1xf32>
    %121 = tpu.matmul %119, %120, %cst_51 {dimension_numbers = #tpu.dot_dimension_numbers<[1], [0], [0], [1], [0, 0, 1, 1], [], []>} : vector<2x32xf32>, vector<32x1xf32>, vector<2x1xf32> -> vector<2x1xf32>
    %c322 = arith.constant 322 : index
    %c0_52 = arith.constant 0 : index
    %122 = vector.load %arg2[%c322, %c0_52] : memref<328x64xf32, #tpu.memory_space<vmem>>, vector<1x1xf32>
    %123 = vector.broadcast %122 : vector<1x1xf32> to vector<2x1xf32>
    %124 = arith.addf %121, %123 : vector<2x1xf32>
    %c18 = arith.constant 18 : index
    %c0_53 = arith.constant 0 : index
    %125 = vector.load %arg1[%c18, %c0_53] : memref<24x16xf32, #tpu.memory_space<vmem>>, vector<2x1xf32>
    %cst_54 = arith.constant 0.000000e+00 : f32
    %126 = vector.broadcast %cst_54 : f32 to vector<2x1xf32>
    %127 = arith.maximumf %124, %126 : vector<2x1xf32>
    %128 = math.absf %124 : vector<2x1xf32>
    %cst_55 = arith.constant 0.000000e+00 : f32
    %129 = vector.broadcast %cst_55 : f32 to vector<2x1xf32>
    %130 = arith.subf %129, %128 : vector<2x1xf32>
    %131 = math.exp %130 : vector<2x1xf32>
    %132 = math.log1p %131 : vector<2x1xf32>
    %133 = arith.addf %127, %132 : vector<2x1xf32>
    %134 = arith.mulf %125, %124 : vector<2x1xf32>
    %135 = arith.subf %133, %134 : vector<2x1xf32>
    %cst_56 = arith.constant dense<0.000000e+00> : vector<1xf32>
    %136 = vector.multi_reduction <add>, %135, %cst_56 [0] : vector<2x1xf32> to vector<1xf32>
    %137 = vector.shape_cast %136 : vector<1xf32> to vector<1x1xf32>
    %cst_57 = arith.constant 2.000000e+00 : f32
    %138 = vector.broadcast %cst_57 : f32 to vector<1x1xf32>
    %139 = arith.divf %137, %138 : vector<1x1xf32>
    %c0_58 = arith.constant 0 : index
    %c0_59 = arith.constant 0 : index
    %140 = vector.load %arg3[%c0_58, %c0_59] : memref<1x1xf32, #tpu.memory_space<vmem>>, vector<1x1xf32>
    tpu.vector_store %arg3[%c0_58, %c0_59], %139 {strides = array<i32>} : memref<1x1xf32, #tpu.memory_space<vmem>>, vector<1x1xf32>,
    return
  }
}

</mosaic_0001>

<bundles_post_ra>
// kernel: tpu_custom_call.1
= control target key start
LH: loop header
LB: loop body
LE: loop exit
PB: predicated region body
PF: predicated region fallthrough
CT: control target
= control target key end

     0   :  { %v1514_v2 = vmov 0   ;;  %s1767_s0 = inlined_call_operand.vmem [shape: s32[16,1], index: 0, kind: input, shape index: {}]   ;;  %s1768_s1 = inlined_call_operand.vmem [shape: f32[24,16], index: 1, kind: input, shape index: {}]   ;;  %s1769_s2 = inlined_call_operand.vmem [shape: f32[328,64], index: 2, kind: input, shape index: {}]   ;;  %s1770_s3 = inlined_call_operand.hbm [shape: f32[1,1], index: 3, kind: output, shape index: {}]  }
   0x1   :  { %v17_v0 = vld [vmem:[%s1767_s0] sm:$0xff]  ;;  %1465 = vset.pattern.permute.xlu0 %v1514_v2  ;;  %v30_v3 = vld [vmem:[%s1769_s2 + $0x8] sm:$0xff]  ;;  %v31_v4 = vld [vmem:[%s1769_s2 + $0x10] sm:$0xff] }
   0x2   :  { %v29_v1 = vld [vmem:[%s1769_s2] sm:$0xff]  ;;  %v32_v5 = vld [vmem:[%s1769_s2 + $0x18] sm:$0xff]  ;;  %20 = vperm.xlu0 %1465, %v17_v0  }
   0x3   :  { %v1373_v6 = vpack.c.bf16 %v30_v3, %v29_v1  ;;  %v1377_v7 = vpack.c.bf16 %v32_v5, %v31_v4 }
   0x4   :  { %8 = vsyncpa [#allocation3], 0  ;;  %v18_v8 = vld [vmem:[%s1767_s0 + $0x8] sm:$0xff]  ;;  %v33_v9 = vld [vmem:[%s1769_s2 + $0x20] sm:$0xff]  ;;  %v15_v22 = vlaneseq  ;;  %vm36_vm0 = vcmask 457728   ;;  %v1515_v25 = vmov 0.0  }
   0x5   :  { %v34_v10 = vld [vmem:[%s1769_s2 + $0x28] sm:$0xff]  ;;  %1374 = vmatprep.subr.bf16.mxu0 %v1373_v6  ;;  %v118_v12 = vld [vmem:[%s1769_s2 + $0x38] sm:$0xff]  ;;  %v119_v13 = vld [vmem:[%s1769_s2 + $0x40] sm:$0xff]  ;;  %vm127_vm3 = vcmask 261120   ;;  %vm470_vm5 = vcmask 130048   ;;  %vm828_vm6 = vcmask 523264  }
   0x6   :  { %1376 = vmatpush3.bf16.msra.mxu0 %v1373_v6  ;;  %23 = vperm.xlu0 %1465, %v18_v8   ;;  %v1381_v11 = vpack.c.bf16 %v34_v10, %v33_v9  ;;  %v1385_v14 = vpack.c.bf16 %v119_v13, %v118_v12  ;;  %v120_v15 = vld [vmem:[%s1769_s2 + $0x48] sm:$0xff]  ;;  %v121_v16 = vld [vmem:[%s1769_s2 + $0x50] sm:$0xff]  ;;  %v293_v19 = vld [vmem:[%s1769_s2 + $0x78] sm:$0xff]  ;;  %v16_v23 = vand.u32 127, %v15_v22  ;;  %vm1517_vm7 = vmmov 0  }
   0x7   :  { %1378 = vmatprep.subr.bf16.mxu0 %v1377_v7  ;;  %v1389_v17 = vpack.c.bf16 %v121_v16, %v120_v15  ;;  %v35_v18 = vld [vmem:[%s1769_s2 + $0x30] sm:$0xff]  ;;  %v294_v20 = vld [vmem:[%s1769_s2 + $0x80] sm:$0xff]  ;;  %v295_v27 = vld [vmem:[%s1769_s2 + $0x88] sm:$0xff]  ;;  %vm1126_vm9 = vcmask 1024   ;;  %vm1136_vm10 = vcmask 0  }
   0x8   :  { %1386 = vmatprep.subr.bf16.mxu1 %v1385_v14  ;;  %v1401_v21 = vpack.c.bf16 %v294_v20, %v293_v19  ;;  %v296_v28 = vld [vmem:[%s1769_s2 + $0x90] sm:$0xff]  ;;  %v209_v32 = vld [vmem:[%s1769_s2 + $0x58] sm:$0xff]  ;;  %v210_v33 = vld [vmem:[%s1769_s2 + $0x60] sm:$0xff] }
   0x9   :  { %1388 = vmatpush3.bf16.msra.mxu1 %v1385_v14  ;;  %v1405_v30 = vpack.c.bf16 %v296_v28, %v295_v27  ;;  %v1393_v34 = vpack.c.bf16 %v210_v33, %v209_v32  ;;  %v211_v35 = vld [vmem:[%s1769_s2 + $0x68] sm:$0xff]  ;;  %v212_v36 = vld [vmem:[%s1769_s2 + $0x70] sm:$0xff]  ;;  %v1160_v40 = vld [vmem:[%s1769_s2 + $0x13a] ss:$0 sm:$0xff] }
   0xa   :  { %1380 = vmatpush3.bf16.msra.mxu0 %v1377_v7  ;;  %1390 = vmatprep.subr.bf16.mxu1 %v1389_v17  ;;  %v1397_v39 = vpack.c.bf16 %v212_v36, %v211_v35  ;;  %v1154_v41 = vld [vmem:[%s1769_s2 + $0x138] ss:$0 sm:$0xff]  ;;  %v1157_v50 = vld [vmem:[%s1769_s2 + $0x139] ss:$0 sm:$0xff]  ;;  %vm1410_vm4 = vmpackc.low %vm127_vm3, %vm127_vm3 }
   0xb   :  { %1382 = vmatprep.subr.bf16.mxu0 %v1381_v11  ;;  %v466_v59 = vld [vmem:[%s1768_s1] sm:$0xff]  ;;  %v467_v62 = vld [vmem:[%s1768_s1 + $0x8] sm:$0xff]  ;;  %v574_v13 = vld [vmem:[%s1769_s2 + $0x98] sm:$0xff] }
   0xc   :  { %v575_v14 = vld [vmem:[%s1769_s2 + $0xa0] sm:$0xff]  ;;  %v576_v15 = vld [vmem:[%s1769_s2 + $0xa8] sm:$0xff]  ;;  %v1169_v28 = vld [vmem:[%s1769_s2 + $0x13b] ss:$0 sm:$0xff] }
   0xd   :  { %1392 = vmatpush3.bf16.msra.mxu1 %v1389_v17  ;;  %v1419_v16 = vpack.c.bf16 %v575_v14, %v574_v13  ;;  %v577_v17 = vld [vmem:[%s1769_s2 + $0xb0] sm:$0xff]  ;;  %v821_v14 = vld [vmem:[%s1769_s2 + $0x108] sm:$0xff] }
   0xe   :  { %1384 = vmatpush3.bf16.msra.mxu0 %v1381_v11  ;;  %1394 = vmatprep.subr.bf16.mxu1 %v1393_v34 }
   0xf   :  { %1262 = vmatprep.subr.mxu0 %v35_v18 }
  0x12   :  { %1263 = vmatpush3.msra.mxu0 %v35_v18  ;;  %v1423_v18 = vpack.c.bf16 %v577_v17, %v576_v15  ;;  %v822_v15 = vld [vmem:[%s1769_s2 + $0x110] sm:$0xff]  ;;  %v1174_v17 = vld [vmem:[%s1769_s2 + $0x140] ss:$0 sm:$0xff] }
  0x13   :  { %1402 = vmatprep.subr.bf16.mxu0 %v1401_v21 }
  0x81   :  { %v21_v24 = vpop.permute.xlu0 %20 }
  0x82   :  { %vm25_vm1 = vcmp.eq.s32.totalorder %v21_v24, %v16_v23 }
  0x83   :  { %v27_v26 = vsel %vm25_vm1, 1.0, %v1515_v25 }
  0x84   :  { %1264 = vmatprep.mubr.msk.f32.mxu0 %vm36_vm0, %v27_v26 }
  0x85   :  { %v24_v29 = vpop.permute.xlu0 %23 }
  0x86   :  { %vm26_vm2 = vcmp.eq.s32.totalorder %v24_v29, %v16_v23 }
  0x87   :  { %v28_v31 = vsel %vm26_vm2, 1.0, %v1515_v25 }
  0x88   :  { %1265 = vmatmul.mubr.msk.f32.vlgmr.msra.gmra.mrb[0].mxu0 %vm36_vm0, %v28_v31 }
  0x89   :  { %1404 = vmatpush3.bf16.msra.mxu0 %v1401_v21 }
  0x8a   :  { %1406 = vmatprep.subr.bf16.mxu0 %v1405_v30 }
  0x8d   :  { %1408 = vmatpush3.bf16.msra.mxu0 %v1405_v30 }
 0x15b   :  { %v1604_v37 = vpop.f32.mrb[0].mxu0 }
 0x15c   :  { %v1606_v38 = vpop.f32.mrb[1].mxu0 }
 0x15d   :  { %1275 = vmatprep.mubr.msk.f32.mxu1 %vm127_vm3, %v1606_v38  ;;  %1297 = vmatprep.mubr.msk.f32.mxu0 %vm127_vm3, %v1606_v38 }
 0x15e   :  { %1276 = vmatmul.mubr.msk.f32.vlgmr.msra.gmra.mrb[0].mxu1 %vm127_vm3, %v1604_v37  ;;  %1298 = vmatmul.mubr.msk.f32.vlgmr.msra.gmra.mrb[2].mxu0 %vm127_vm3, %v1604_v37 }
 0x15f   :  { %1396 = vmatpush3.bf16.msra.mxu1 %v1393_v34  ;;  %1286 = vmatprep.mubr.msk.f32.mxu1 %vm127_vm3, %v1606_v38 }
 0x160   :  { %1398 = vmatprep.subr.bf16.mxu1 %v1397_v39 }
 0x163   :  { %1400 = vmatpush3.bf16.msra.mxu1 %v1397_v39 }
 0x166   :  { %1287 = vmatmul.mubr.msk.f32.vlgmr.msra.gmra.mrb[2].mxu1 %vm127_vm3, %v1604_v37 }
 0x231   :  { %v1277_v42 = vpop.f32.mrb[0].mxu1  ;;  %v1299_v43 = vpop.f32.mrb[2].mxu0 }
 0x232   :  { %v374_v44 = vadd.f32 %v1299_v43, %v1160_v40  ;;  %v200_v45 = vpop.f32.mrb[1].mxu1  ;;  %v368_v46 = vpop.f32.mrb[3].mxu0  ;;  %v206_v56 = vadd.f32 %v1277_v42, %v1154_v41 }
 0x233   :  { %v201_v47 = vadd.f32 %v1154_v41, %v200_v45  ;;  %v369_v48 = vadd.f32 %v1160_v40, %v368_v46 }
 0x235   :  { %v1415_v49 = vpack.c.bf16 %v374_v44, %v369_v48  ;;  %1304 = vmatprep.mubr.msk.f32.mxu1 %vm127_vm3, %v201_v47  ;;  %v708_v48 = vld [vmem:[%s1769_s2 + $0xc0] sm:$0xff] }
 0x237   :  { %1416 = vmatprep.subr.bf16.mxu0 %v1415_v49 }
 0x238   :  { %1418 = vmatpush3.bf16.msra.mxu0 %v1415_v49 }
 0x239   :  { %v1288_v51 = vpop.f32.mrb[2].mxu1 }
 0x23a   :  { %v290_v52 = vadd.f32 %v1288_v51, %v1157_v50  ;;  %v284_v53 = vpop.f32.mrb[3].mxu1  ;;  %v710_v51 = vld [vmem:[%s1769_s2 + $0xd0] sm:$0xff] }
 0x23b   :  { %v285_v54 = vadd.f32 %v1157_v50, %v284_v53  ;;  %v709_v50 = vld [vmem:[%s1769_s2 + $0xc8] sm:$0xff] }
 0x23d   :  { %v1409_v55 = vpack.c.bf16 %v290_v52, %v285_v54  ;;  %v1431_v52 = vpack.c.bf16 %v710_v51, %v709_v50 }
 0x23f   :  { %1411 = vmatprep.subr.msk.bf16.mxu1 %vm1410_vm4, %v1409_v55 }
 0x240   :  { %1414 = vmatpush3.bf16.xpose.msk.msra.mxu1 %vm1410_vm4, %v1409_v55 }
 0x241   :  { %1420 = vmatprep.subr.bf16.mxu1 %v1419_v16 }
 0x247   :  { %1305 = vmatmul.mubr.msk.f32.vlgmr.msra.gmra.mrb[4].mxu1 %vm127_vm3, %v206_v56 }
 0x248   :  { %1422 = vmatpush3.bf16.msra.mxu1 %v1419_v16  ;;  %v1447_v16 = vpack.c.bf16 %v822_v15, %v821_v14  ;;  %v1027_v14 = vld [vmem:[%s1769_s2 + $0x120] sm:$0xff] }
 0x249   :  { %1424 = vmatprep.subr.bf16.mxu1 %v1423_v18 }
 0x24c   :  { %1426 = vmatpush3.bf16.msra.mxu1 %v1423_v18 }
 0x31a   :  { %v1306_v57 = vpop.f32.mrb[4].mxu1 }
 0x31b   :  { %v455_v58 = vpop.f32.mrb[5].mxu1  ;;  %v465_v60 = vmul.f32 0.17677669, %v1306_v57 }
 0x31c   :  { %v464_v61 = vmul.f32 0.17677669, %v455_v58 }
 0x31d   :  { %v469_v1 = vadd.f32 %v467_v62, %v465_v60  ;;  %v1172_v60 = vld [vmem:[%s1769_s2 + $0x13c] ss:$0 sm:$0xff]  ;;  %v1173_v62 = vld [vmem:[%s1769_s2 + $0x13d] ss:$0 sm:$0xff] }
 0x31e   :  { %v468_v63 = vadd.f32 %v466_v59, %v464_v61 }
 0x31f   :  { %v474_v2 = vsel %vm470_vm5, %v469_v1, -inf }
 0x320   :  { %v471_v0 = vsel %vm470_vm5, %v468_v63, -inf }
 0x321   :  { %472 = vmax.xlane.f32.xlu1 %v471_v0 }
 0x325   :  { %475 = vmax.xlane.f32.xlu1 %v474_v2 }
 0x3ae   :  { %v473_v3 = vpop.xlane.xlu1 %472 }
 0x3af   :  { %v477_v4 = vsub.f32 %v468_v63, %v473_v3 }
 0x3b1   :  { %v479_v5 = vmul.f32 1.442695, %v477_v4 }
 0x3b2   :  { %v476_v6 = vpop.xlane.xlu1 %475 }
 0x3b3   :  { %1466 = vpow2.f32 %v479_v5  ;;  %v478_v7 = vsub.f32 %v469_v1, %v476_v6  ;;  %v815_v5 = vld [vmem:[%s1769_s2 + $0xd8] sm:$0xff]  ;;  %v816_v6 = vld [vmem:[%s1769_s2 + $0xe0] sm:$0xff] }
 0x3b5   :  { %v481_v8 = vmul.f32 1.442695, %v478_v7  ;;  %v1435_v7 = vpack.c.bf16 %v816_v6, %v815_v5  ;;  %v1180_v5 = vld [vmem:[%s1769_s2 + $0x13e] ss:$0 sm:$0xff] }
 0x3b7   :  { %1468 = vpow2.f32 %v481_v8  ;;  %v817_v8 = vld [vmem:[%s1769_s2 + $0xe8] sm:$0xff]  ;;  %1436 = vmatprep.subr.bf16.mxu1 %v1435_v7 }
 0x3bd   :  { %v1467_v9 = vpop.eup %1466 }
 0x3be   :  { %v483_v10 = vsel %vm470_vm5, %v1467_v9, 0.0 }
 0x3bf   :  { %484 = vadd.xlane.f32.xlu0 %v483_v10  ;;  %v819_v10 = vld [vmem:[%s1769_s2 + $0xf8] sm:$0xff] }
 0x3c1   :  { %v1469_v11 = vpop.eup %1468 }
 0x3c2   :  { %v486_v12 = vsel %vm470_vm5, %v1469_v11, 0.0 }
 0x3c3   :  { %487 = vadd.xlane.f32.xlu1 %v486_v12  ;;  %v820_v12 = vld [vmem:[%s1769_s2 + $0x100] sm:$0xff] }
 0x3c4   :  { %v1443_v13 = vpack.c.bf16 %v820_v12, %v819_v10 }
 0x44c   :  { %v485_v19 = vpop.xlane.xlu0 %484 }
 0x44d   :  { %1470 = vrcp.f32 %v485_v19 }
 0x450   :  { %v488_v20 = vpop.xlane.xlu1 %487 }
 0x451   :  { %1472 = vrcp.f32 %v488_v20 }
 0x457   :  { %v1471_v21 = vpop.eup %1470 }
 0x458   :  { %v491_v22 = vmul.f32 %v1471_v21, %v1467_v9  ;;  %v818_v9 = vld [vmem:[%s1769_s2 + $0xf0] sm:$0xff] }
 0x45a   :  { %1311 = vmatprep.mubr.msk.f32.mxu0 %vm470_vm5, %v491_v22 }
 0x45b   :  { %v1473_v23 = vpop.eup %1472 }
 0x45c   :  { %v492_v24 = vmul.f32 %v1473_v23, %v1469_v11  ;;  %v1439_v11 = vpack.c.bf16 %v818_v9, %v817_v8  ;;  %v1181_v9 = vld [vmem:[%s1769_s2 + $0x13f] ss:$0 sm:$0xff] }
 0x45e   :  { %1312 = vmatmul.mubr.msk.f32.vlgmr.msra.gmra.mrb[4].mxu0 %vm470_vm5, %v492_v24 }
 0x531   :  { %v1313_v26 = vpop.f32.mrb[4].mxu0 }
 0x532   :  { %v565_v27 = vpop.f32.mrb[5].mxu0 }
 0x533   :  { %1322 = vmatprep.mubr.msk.f32.mxu1 %vm127_vm3, %v565_v27 }
 0x534   :  { %1323 = vmatmul.mubr.msk.f32.vlgmr.msra.gmra.mrb[6].mxu1 %vm127_vm3, %v1313_v26 }
 0x535   :  { %1438 = vmatpush3.bf16.msra.mxu1 %v1435_v7 }
 0x536   :  { %1440 = vmatprep.subr.bf16.mxu1 %v1439_v11 }
 0x539   :  { %1442 = vmatpush3.bf16.msra.mxu1 %v1439_v11 }
 0x53a   :  { %1444 = vmatprep.subr.bf16.mxu1 %v1443_v13 }
 0x53d   :  { %1446 = vmatpush3.bf16.msra.mxu1 %v1443_v13  ;;  %v1026_v13 = vld [vmem:[%s1769_s2 + $0x118] sm:$0xff] }
 0x53e   :  { %1448 = vmatprep.subr.bf16.mxu1 %v1447_v16 }
 0x541   :  { %1450 = vmatpush3.bf16.msra.mxu1 %v1447_v16  ;;  %v952_v16 = vld [vmem:[%s1768_s1 + $0x10] sm:$0x3] }
 0x607   :  { %v1324_v29 = vpop.f32.mrb[6].mxu1 }
 0x608   :  { %v661_v30 = vadd.f32 %v1324_v29, %v1169_v28  ;;  %v655_v31 = vpop.f32.mrb[7].mxu1 }
 0x609   :  { %v656_v32 = vadd.f32 %v1169_v28, %v655_v31 }
 0x60a   :  { %v665_v33 = vadd.f32 %v1604_v37, %v661_v30 }
 0x60b   :  { %v664_v34 = vadd.f32 %v656_v32, %v1606_v38  ;;  %v707_v38 = vld [vmem:[%s1769_s2 + $0xb8] sm:$0xff] }
 0x60c   :  { %v671_v36 = vsel %vm127_vm3, %v665_v33, 0.0  ;;  %v1427_v49 = vpack.c.bf16 %v708_v48, %v707_v38 }
 0x60d   :  { %v668_v35 = vsel %vm127_vm3, %v664_v34, 0.0 }
 0x60e   :  { %669 = vadd.xlane.f32.xlu1 %v668_v35  ;;  %1428 = vmatprep.subr.bf16.mxu0 %v1427_v49 }
 0x60f   :  { %1430 = vmatpush3.bf16.msra.mxu0 %v1427_v49 }
 0x610   :  { %1432 = vmatprep.subr.bf16.mxu0 %v1431_v52 }
 0x612   :  { %672 = vadd.xlane.f32.xlu1 %v671_v36 }
 0x613   :  { %1434 = vmatpush3.bf16.msra.mxu0 %v1431_v52 }
 0x69b   :  { %v670_v39 = vpop.xlane.xlu1 %669 }
 0x69c   :  { %v675_v40 = vmul.f32 0.03125, %v670_v39 }
 0x69e   :  { %v677_v41 = vsub.f32 %v664_v34, %v675_v40 }
 0x69f   :  { %v673_v42 = vpop.xlane.xlu1 %672 }
 0x6a0   :  { %v676_v43 = vmul.f32 0.03125, %v673_v42  ;;  %v679_v44 = vmul.f32 %v677_v41, %v677_v41 }
 0x6a2   :  { %v678_v45 = vsub.f32 %v665_v33, %v676_v43  ;;  %v681_v46 = vsel %vm127_vm3, %v679_v44, 0.0  ;;  %v1177_v43 = vld [vmem:[%s1769_s2 + $0x141] ss:$0 sm:$0xff] }
 0x6a3   :  { %682 = vadd.xlane.f32.xlu1 %v681_v46 }
 0x6a4   :  { %v680_v47 = vmul.f32 %v678_v45, %v678_v45 }
 0x6a6   :  { %v684_v37 = vsel %vm127_vm3, %v680_v47, 0.0 }
 0x6a7   :  { %685 = vadd.xlane.f32.xlu1 %v684_v37 }
 0x730   :  { %v683_v53 = vpop.xlane.xlu1 %682 }
 0x731   :  { %v687_v54 = vmul.f32 0.03125, %v683_v53 }
 0x733   :  { %v689_v55 = vadd.f32 1e-12, %v687_v54 }
 0x734   :  { %v686_v56 = vpop.xlane.xlu1 %685 }
 0x735   :  { %1474 = vrsqrt.f32 %v689_v55  ;;  %v688_v57 = vmul.f32 0.03125, %v686_v56 }
 0x737   :  { %v690_v58 = vadd.f32 1e-12, %v688_v57 }
 0x739   :  { %1476 = vrsqrt.f32 %v690_v58 }
 0x73f   :  { %v1475_v59 = vpop.eup %1474 }
 0x740   :  { %v693_v61 = vmul.f32 %v1475_v59, %v677_v41 }
 0x742   :  { %v699_v63 = vmul.f32 %v1172_v60, %v693_v61 }
 0x743   :  { %v1477_v0 = vpop.eup %1476 }
 0x744   :  { %v694_v1 = vmul.f32 %v1477_v0, %v678_v45  ;;  %v705_v2 = vadd.f32 %v1173_v62, %v699_v63 }
 0x746   :  { %v700_v3 = vmul.f32 %v1172_v60, %v694_v1  ;;  %1333 = vmatprep.mubr.msk.f32.mxu0 %vm127_vm3, %v705_v2  ;;  %v1516_v60 = vmov 0.0|0.0  }
 0x747   :  { %1451 = vmatprep.subr.bf16.mxu0 %v1516_v60 }
 0x748   :  { %v706_v4 = vadd.f32 %v1173_v62, %v700_v3 }
 0x74a   :  { %1334 = vmatmul.mubr.msk.f32.vlgmr.msra.gmra.mrb[6].mxu0 %vm127_vm3, %v706_v4 }
 0x74b   :  { %1359 = vmatprep.mubr.msk.f32.mxu0 %vm1517_vm7, %v1515_v25 }
 0x81d   :  { %v1335_v18 = vpop.f32.mrb[6].mxu0 }
 0x81e   :  { %v794_v19 = vadd.f32 %v1335_v18, %v1174_v17  ;;  %v788_v20 = vpop.f32.mrb[7].mxu0  ;;  %v1028_v18 = vld [vmem:[%s1769_s2 + $0x128] sm:$0xff] }
 0x81f   :  { %v789_v21 = vadd.f32 %v1174_v17, %v788_v20  ;;  %v1455_v17 = vpack.c.bf16 %v1027_v14, %v1026_v13 }
 0x820   :  { %v800_v22 = vmul.f32 0.044715, %v794_v19  ;;  %v798_v40 = vmul.f32 0.5, %v794_v19 }
 0x821   :  { %v799_v23 = vmul.f32 0.044715, %v789_v21  ;;  %v797_v36 = vmul.f32 0.5, %v789_v21 }
 0x822   :  { %v802_v24 = vmul.f32 %v800_v22, %v794_v19 }
 0x823   :  { %v801_v26 = vmul.f32 %v799_v23, %v789_v21  ;;  %v1183_v23 = vld [vmem:[%s1769_s2 + $0x142] ss:$0 sm:$0xff] }
 0x824   :  { %v804_v27 = vmul.f32 %v802_v24, %v794_v19 }
 0x825   :  { %v803_v28 = vmul.f32 %v801_v26, %v789_v21 }
 0x826   :  { %v806_v29 = vadd.f32 %v804_v27, %v794_v19  ;;  %v1029_v19 = vld [vmem:[%s1769_s2 + $0x130] sm:$0xff]  ;;  %s1518_s2 = smov [#allocation2]  }
 0x827   :  { %v805_v30 = vadd.f32 %v803_v28, %v789_v21  ;;  %v1458_v20 = vpack.c.bf16 %v1029_v19, %v1028_v18  ;;  %s1144_s12 = sshll.u32 %s1518_s2, 4  ;;  %s1145_s12 = int_to_ptr.vmem [resolvable:$true] %s1144_s12 }
 0x828   :  { %v808_v31 = vmul.f32 0.7978846, %v806_v29  ;;  %s1494_s13 = scalar_lea.vmem %s1145_s12, 32  ;;  %p1495_p1 = scmp.lt.s32.totalorder %s1145_s12, %s1145_s12 }
 0x829   :  { %v807_v32 = vmul.f32 0.7978846, %v805_v30 }
 0x82a   :  { %1478 = vtanh.f32 %v808_v31 }
 0x82b   :  { %1480 = vtanh.f32 %v807_v32 }
 0x834   :  { %v1479_v33 = vpop.eup %1478 }
 0x835   :  { %v1481_v34 = vpop.eup %1480  ;;  %v812_v35 = vadd.f32 1.0, %v1479_v33 }
 0x836   :  { %v811_v39 = vadd.f32 1.0, %v1481_v34 }
 0x837   :  { %v814_v42 = vmul.f32 %v812_v35, %v798_v40 }
 0x838   :  { %v813_v41 = vmul.f32 %v811_v39, %v797_v36  ;;  %v1108_v36 = vld [vmem:[%s1768_s1 + $0x12] sm:$0x3]  ;;  %s1490_s1 = scalar_lea.vmem %s1145_s12, 16 }
 0x839   :  { %p1491_p0 = scmp.ne.s32.totalorder %s1145_s12, %s1490_s1  ;;  %p1496_p2 = scmp.lt.s32.totalorder %s1494_s13, %s1490_s1 }
 0x83a   :  { %1352 = vmatprep.mubr.msk.f32.mxu1 %vm828_vm6, %v813_v41 }
 0x83b   :  { %1353 = vmatmul.mubr.msk.f32.vlgmr.msra.gmra.mrb[8].mxu1 %vm828_vm6, %v814_v42  ;;  %p1497_p3 = por %p1496_p2, %p1495_p1 }
 0x83d   :  { %p1498_p4 = pnand %p1497_p3, %p1491_p0 }
 0x90e   :  { %v1354_v44 = vpop.f32.mrb[8].mxu1 }
 0x90f   :  { %v901_v45 = vpop.f32.mrb[9].mxu1  ;;  %v907_v46 = vadd.f32 %v1354_v44, %v1177_v43 }
 0x910   :  { %v902_v47 = vadd.f32 %v1177_v43, %v901_v45 }
 0x911   :  { %v911_v48 = vadd.f32 %v907_v46, %v706_v4 }
 0x912   :  { %v910_v37 = vadd.f32 %v902_v47, %v705_v2 }
 0x913   :  { %v917_v49 = vsel %vm127_vm3, %v911_v48, 0.0 }
 0x914   :  { %v914_v38 = vsel %vm127_vm3, %v910_v37, 0.0 }
 0x915   :  { %915 = vadd.xlane.f32.xlu1 %v914_v38 }
 0x919   :  { %918 = vadd.xlane.f32.xlu1 %v917_v49 }
 0x9a2   :  { %v916_v50 = vpop.xlane.xlu1 %915 }
 0x9a3   :  { %v920_v51 = vmul.f32 0.03125, %v916_v50 }
 0x9a5   :  { %v922_v52 = vsub.f32 %v910_v37, %v920_v51 }
 0x9a6   :  { %v919_v53 = vpop.xlane.xlu1 %918 }
 0x9a7   :  { %v921_v54 = vmul.f32 0.03125, %v919_v53  ;;  %v924_v55 = vmul.f32 %v922_v52, %v922_v52 }
 0x9a9   :  { %v923_v56 = vsub.f32 %v911_v48, %v921_v54  ;;  %v926_v57 = vsel %vm127_vm3, %v924_v55, 0.0 }
 0x9aa   :  { %927 = vadd.xlane.f32.xlu1 %v926_v57 }
 0x9ab   :  { %v925_v58 = vmul.f32 %v923_v56, %v923_v56 }
 0x9ad   :  { %v929_v59 = vsel %vm127_vm3, %v925_v58, 0.0 }
 0x9ae   :  { %930 = vadd.xlane.f32.xlu0 %v929_v59 }
 0xa37   :  { %v928_v61 = vpop.xlane.xlu1 %927 }
 0xa38   :  { %v932_v62 = vmul.f32 0.03125, %v928_v61 }
 0xa3a   :  { %v934_v63 = vadd.f32 1e-12, %v932_v62 }
 0xa3b   :  { %v931_v0 = vpop.xlane.xlu0 %930 }
 0xa3c   :  { %1482 = vrsqrt.f32 %v934_v63  ;;  %v933_v1 = vmul.f32 0.03125, %v931_v0 }
 0xa3e   :  { %v935_v2 = vadd.f32 1e-12, %v933_v1 }
 0xa40   :  { %1484 = vrsqrt.f32 %v935_v2 }
 0xa46   :  { %v1483_v3 = vpop.eup %1482 }
 0xa47   :  { %v938_v4 = vmul.f32 %v1483_v3, %v922_v52 }
 0xa49   :  { %v944_v8 = vmul.f32 %v1180_v5, %v938_v4 }
 0xa4a   :  { %v1485_v6 = vpop.eup %1484 }
 0xa4b   :  { %v939_v7 = vmul.f32 %v1485_v6, %v923_v56  ;;  %v950_v11 = vadd.f32 %v1181_v9, %v944_v8 }
 0xa4d   :  { %v945_v10 = vmul.f32 %v1180_v5, %v939_v7 }
 0xa4f   :  { %v951_v12 = vadd.f32 %v1181_v9, %v945_v10 }
 0xa51   :  { %v1452_v15 = vpack.c.bf16 %v951_v12, %v950_v11 }
 0xa53   :  { %1453 = vmatpush3.bf16.msra.mxu0 %v1452_v15 }
 0xa54   :  { %1454 = vmatprep.subr.bf16.mxu0 %v1516_v60 }
 0xa56   :  { %1360 = vmatmul.mubr.msk.f32.vlgmr.msra.gmra.mrb[8].mxu0 %vm470_vm5, %v952_v16 }
 0xa57   :  { %1456 = vmatpush3.bf16.msra.mxu0 %v1455_v17  ;;  %1370 = vmatprep.mubr.msk.f32.mxu0 %vm1517_vm7, %v1515_v25 }
 0xa58   :  { %1457 = vmatprep.subr.bf16.mxu0 %v1516_v60 }
 0xa5b   :  { %1459 = vmatpush3.bf16.msra.mxu0 %v1458_v20 }
 0xb29   :  { %v1022_v21 = vpop.f32.mrb[8].mxu0 }
 0xb2a   :  { %v1361_v22 = vpop.f32.mrb[9].mxu0  ;;  %1371 = vmatmul.mubr.msk.f32.vlgmr.msra.gmra.mrb[10].mxu0 %vm127_vm3, %v1022_v21 }
 0xbfd   :  { %v1104_v24 = vpop.f32.mrb[10].mxu0 }
 0xbfe   :  { %v1105_v26 = vadd.f32 %v1183_v23, %v1104_v24  ;;  %v1372_v27 = vpop.f32.mrb[11].mxu0 }
 0xc00   :  { %v1110_v28 = vand.u32 2147483647, %v1105_v26  ;;  %v1109_v41 = vmax.f32 %v1105_v26, 0.0  ;;  %v1124_v44 = vmul.f32 %v1108_v36, %v1105_v26 }
 0xc02   :  { %v1111_v29 = vsub.f32 0.0, %v1110_v28 }
 0xc04   :  { %v1112_v30 = vmul.f32 1.442695, %v1111_v29 }
 0xc06   :  { %1486 = vpow2.f32 %v1112_v30 }
 0xc10   :  { %v1487_v31 = vpop.eup %1486 }
 0xc11   :  { %v1114_v32 = vadd.f32 1.0, %v1487_v31  ;;  %v1117_v25 = vmul.f32 -0.5, %v1487_v31  ;;  %v1120_v34 = vand.u32 2147483647, %v1487_v31 }
 0xc13   :  { %1488 = vlog2.f32 %v1114_v32  ;;  %v1118_v33 = vadd.f32 1.0, %v1117_v25  ;;  %vm1121_vm8 = vcmp.lt.f32.partialorder %v1120_v34, 0.0004427343 }
 0xc15   :  { %v1119_v40 = vmul.f32 %v1487_v31, %v1118_v33 }
 0xc1d   :  { %v1489_v35 = vpop.eup %1488 }
 0xc1e   :  { %v1116_v39 = vmul.f32 0.6931472, %v1489_v35 }
 0xc20   :  { %v1122_v42 = vsel %vm1121_vm8, %v1119_v40, %v1116_v39 }
 0xc21   :  { %v1123_v43 = vadd.f32 %v1122_v42, %v1109_v41 }
 0xc23   :  { %v1125_v45 = vsub.f32 %v1123_v43, %v1124_v44 }
 0xc25   :  { %v1127_v46 = vsel %vm1126_vm9, %v1125_v45, 0.0 }
 0xc26   :  { %v1128_v47 = vrot.slane %v1127_v46, 4 }
 0xc28   :  { %v1129_v37 = vadd.f32 %v1128_v47, %v1127_v46 }
 0xc2a   :  { %v1130_v38 = vrot.slane %v1129_v37, 2 }
 0xc2c   :  { %v1131_v48 = vadd.f32 %v1130_v38, %v1129_v37 }
 0xc2e   :  { %v1132_v49 = vrot.slane %v1131_v48, 1 }
 0xc30   :  { %v1133_v50 = vadd.f32 %v1132_v49, %v1131_v48 }
 0xc32   :  { %v1135_v51 = vmul.f32 0.5, %v1133_v50 }
 0xc34   :  { %1137 = vst.msk [vmem:[#allocation2] sm:$0x1] %vm1136_vm10, %v1135_v51 }
 0xc35   :  { %1501 = shalt.err (!%p1498_p4)
}
 0xc36   :  { %s1502_s16 = scalar_lea.hbm %s1770_s3, 16 }
 0xc37   :  { %p1503_p5 = scmp.ne.s32.totalorder %s1770_s3, %s1502_s16  ;;  %p1506_p6 = scmp.lt.u32.totalorder %s1502_s16, %s1770_s3 }
 0xc39   :  { %p1508_p7 = pnand %p1506_p6, %p1503_p5 }
 0xc3b   :  { %1511 = shalt.err (!%p1508_p7)
}
 0xc3c   :  { %1147 = dma.vmem_to_hbm [thread:$0]  %s1145_s12, 16, %s1770_s3, [#allocation3]  }
 0xc3d   :  { %1512 = dma.done.wait [#allocation3], 16  }
 0xc3e   :  { %1513 = vsyncadd [#allocation3], 4294967280 }
 0xc3f   :  { %1151 = vsyncpa [#allocation3], 1 }

</bundles_post_ra>
